<compile_context>
chip_gen: v7x
topology: tpu7x:2x2x1
jax: 0.10.0
libtpu: 0.0.40
codegen_flags: <defaults>
</compile_context>

<pallas_src>
import functools

import jax
import jax.numpy as jnp
from jax.experimental import pallas as pl
from jax.experimental.pallas import tpu as pltpu


def _outconv_kernel(x_ref, w_ref, b_ref, o_ref):
    # x_ref: (1, Cin, TR, 128)  VMEM
    # w_ref: (Cout, Cin)        SMEM (f32 scalars)
    # b_ref: (Cout,)            SMEM (f32 scalars)
    # o_ref: (1, Cout, TR, 128) VMEM
    cin = x_ref.shape[1]
    cout = o_ref.shape[1]

    # Load each input-channel slab once — full (TR, 128) sublane/lane-dense vregs.
    xs = [x_ref[0, ci, :, :].astype(jnp.float32) for ci in range(cin)]

    for co in range(cout):
        # out[co] = ((x0*w0 + x1*w1) + (x2*w2 + x3*w3)) + b[co]  (balanced tree)
        terms = [xs[ci] * w_ref[co, ci] for ci in range(cin)]
        while len(terms) > 1:
            nxt = [terms[i] + terms[i + 1] for i in range(0, len(terms) - 1, 2)]
            if len(terms) % 2 == 1:
                nxt.append(terms[-1])
            terms = nxt
        o_ref[0, co, :, :] = (terms[0] + b_ref[co]).astype(o_ref.dtype)


def _choose_tiling(hw, n, max_tile):
    """Pick (tr, rows_padded): rows of 128 pixels per block and padded row count.

    Guarantees:  tr % 8 == 0  OR  tr == rows_padded  (BlockSpec legality),
                 rows_padded % tr == 0,
                 tr * 128 <= max(max_tile, hw rounded up)  (VMEM bound),
                 >= 4 total grid steps when the input size allows it (v7x).
    """
    rows = pl.cdiv(hw, 128)                                   # 128-pixel rows
    max_rows = max(8, (max_tile // 128) // 8 * 8)

    if rows <= max_rows:
        tr = rows                                             # full extent (legal)
        if n < 4 and rows >= 16:
            # Split into multiple-of-8 chunks so both v7x TCs get work and the
            # pipeline has depth.
            target_steps = pl.cdiv(4, n)
            tr = max(8, (rows // target_steps) // 8 * 8)
    else:
        tr = max_rows
        while n * pl.cdiv(rows, tr) < 4 and tr > 8:
            tr = max(8, (tr // 2) // 8 * 8)

    rows_padded = pl.cdiv(rows, tr) * tr
    return tr, rows_padded


@functools.partial(jax.jit, static_argnames=("max_tile",))
def outconv_forward(x_nchw, weight, bias, *, max_tile=65536):
    """1x1 conv forward (torch.nn.Conv2d(kernel_size=1) semantics).

    x_nchw: (N, Cin, H, W)
    weight: (Cout, Cin) or (Cout, Cin, 1, 1)
    bias:   (Cout,)
    returns (N, Cout, H, W)
    """
    n, cin, h, w = x_nchw.shape
    weight = weight.reshape(weight.shape[0], cin)             # handle (Cout,Cin,1,1)
    cout = weight.shape[0]
    hw = h * w

    w_sc = weight.astype(jnp.float32)                         # SMEM scalars (32-bit)
    b_sc = bias.astype(jnp.float32)

    tr, rows_padded = _choose_tiling(hw, n, max_tile)
    hw_pad = rows_padded * 128

    x3 = x_nchw.reshape(n, cin, hw)                           # free reshape (NCHW)
    if hw_pad != hw:
        x3 = jnp.pad(x3, ((0, 0), (0, 0), (0, hw_pad - hw)))  # pad pixel axis once
    x4 = x3.reshape(n, cin, rows_padded, 128)                 # (sublane, lane) slabs

    grid = (n, rows_padded // tr)

    itemsize = jnp.dtype(x4.dtype).itemsize
    cost = pl.CostEstimate(
        flops=2 * n * hw_pad * cin * cout,
        transcendentals=0,
        bytes_accessed=(n * cin * hw_pad * itemsize           # read x
                        + n * cout * hw_pad * itemsize        # write out
                        + (weight.size + bias.size) * 4),
    )

    out4 = pl.pallas_call(
        _outconv_kernel,
        out_shape=jax.ShapeDtypeStruct((n, cout, rows_padded, 128), x4.dtype),
        grid_spec=pltpu.PrefetchScalarGridSpec(
            num_scalar_prefetch=0,
            grid=grid,
            in_specs=[
                pl.BlockSpec((1, cin, tr, 128), lambda ni, mi: (ni, 0, mi, 0)),
                pl.BlockSpec(memory_space=pltpu.MemorySpace.SMEM),
                pl.BlockSpec(memory_space=pltpu.MemorySpace.SMEM),
            ],
            out_specs=pl.BlockSpec((1, cout, tr, 128), lambda ni, mi: (ni, 0, mi, 0)),
        ),
        compiler_params=pltpu.CompilerParams(
            dimension_semantics=("parallel", "parallel")),
        cost_estimate=cost,
    )(x4, w_sc, b_sc)

    out = out4.reshape(n, cout, hw_pad)
    if hw_pad != hw:
        out = out[:, :, :hw]
    return out.reshape(n, cout, h, w)


if __name__ == "__main__":
    # Small shapes consistent with the module: batch=2, in_channels=4,
    # spatial=16x16, out_channels (classes) = 3.
    N, C_IN, H, W = 2, 4, 16, 16
    C_OUT = 3

    key = jax.random.PRNGKey(0)
    kx, kw, kb = jax.random.split(key, 3)

    x = jax.random.normal(kx, (N, C_IN, H, W), dtype=jnp.float32)

    # Deterministic parameter init (torch Conv2d weight shape is (Cout, Cin, 1, 1)).
    bound = 1.0 / (C_IN ** 0.5)
    weight = jax.random.uniform(kw, (C_OUT, C_IN), jnp.float32, -bound, bound)
    bias = jax.random.uniform(kb, (C_OUT,), jnp.float32, -bound, bound)

    y = outconv_forward(x, weight, bias)
    jax.block_until_ready(y)

    # Reference check in plain JAX (same math as torch Conv2d with k=1).
    y_ref = jnp.einsum("nchw,oc->nohw", x, weight) + bias[None, :, None, None]
    assert y.shape == (N, C_OUT, H, W)
    assert jnp.allclose(y, y_ref, atol=1e-5, rtol=1e-5)

    print("KERNEL_OK")
</pallas_src>

<mosaic_0001>
module attributes {stable_mosaic.version = 11 : i64} {
  func.func @_outconv_kernel(%arg0: i32, %arg1: i32, %arg2: memref<1x4x2x128xf32, #tpu.memory_space<vmem>>, %arg3: memref<3x4xf32, #tpu.memory_space<smem>>, %arg4: memref<3xf32, #tpu.memory_space<smem>>, %arg5: memref<1x3x2x128xf32, #tpu.memory_space<vmem>>) attributes {dimension_semantics = [#tpu.dimension_semantics<parallel>, #tpu.dimension_semantics<parallel>], iteration_bounds = array<i64: 2, 1>, scalar_prefetch = 0 : i64, scratch_operands = 0 : i64, tpu.core_type = #tpu.core_type<tc>, window_params = [{transform_indices = @transform_0, window_bounds = array<i64: 1, 4, 2, 128>}, {transform_indices = @transform_1, window_bounds = array<i64: 3, 4>}, {transform_indices = @transform_2, window_bounds = array<i64: 3>}, {transform_indices = @transform_3, window_bounds = array<i64: 1, 3, 2, 128>}]} {
    %c0 = arith.constant 0 : index
    %c0_0 = arith.constant 0 : index
    %c0_1 = arith.constant 0 : index
    %c0_2 = arith.constant 0 : index
    %0 = vector.load %arg2[%c0, %c0_0, %c0_1, %c0_2] : memref<1x4x2x128xf32, #tpu.memory_space<vmem>>, vector<1x1x2x128xf32>
    %1 = vector.shape_cast %0 : vector<1x1x2x128xf32> to vector<2x128xf32>
    %c0_3 = arith.constant 0 : index
    %c1 = arith.constant 1 : index
    %c0_4 = arith.constant 0 : index
    %c0_5 = arith.constant 0 : index
    %2 = vector.load %arg2[%c0_3, %c1, %c0_4, %c0_5] : memref<1x4x2x128xf32, #tpu.memory_space<vmem>>, vector<1x1x2x128xf32>
    %3 = vector.shape_cast %2 : vector<1x1x2x128xf32> to vector<2x128xf32>
    %c0_6 = arith.constant 0 : index
    %c2 = arith.constant 2 : index
    %c0_7 = arith.constant 0 : index
    %c0_8 = arith.constant 0 : index
    %4 = vector.load %arg2[%c0_6, %c2, %c0_7, %c0_8] : memref<1x4x2x128xf32, #tpu.memory_space<vmem>>, vector<1x1x2x128xf32>
    %5 = vector.shape_cast %4 : vector<1x1x2x128xf32> to vector<2x128xf32>
    %c0_9 = arith.constant 0 : index
    %c3 = arith.constant 3 : index
    %c0_10 = arith.constant 0 : index
    %c0_11 = arith.constant 0 : index
    %6 = vector.load %arg2[%c0_9, %c3, %c0_10, %c0_11] : memref<1x4x2x128xf32, #tpu.memory_space<vmem>>, vector<1x1x2x128xf32>
    %7 = vector.shape_cast %6 : vector<1x1x2x128xf32> to vector<2x128xf32>
    %c0_12 = arith.constant 0 : index
    %c0_13 = arith.constant 0 : index
    %8 = memref.load %arg3[%c0_12, %c0_13] : memref<3x4xf32, #tpu.memory_space<smem>>
    %9 = vector.broadcast %8 : f32 to vector<2x128xf32>
    %10 = arith.mulf %1, %9 : vector<2x128xf32>
    %c0_14 = arith.constant 0 : index
    %c1_15 = arith.constant 1 : index
    %11 = memref.load %arg3[%c0_14, %c1_15] : memref<3x4xf32, #tpu.memory_space<smem>>
    %12 = vector.broadcast %11 : f32 to vector<2x128xf32>
    %13 = arith.mulf %3, %12 : vector<2x128xf32>
    %c0_16 = arith.constant 0 : index
    %c2_17 = arith.constant 2 : index
    %14 = memref.load %arg3[%c0_16, %c2_17] : memref<3x4xf32, #tpu.memory_space<smem>>
    %15 = vector.broadcast %14 : f32 to vector<2x128xf32>
    %16 = arith.mulf %5, %15 : vector<2x128xf32>
    %c0_18 = arith.constant 0 : index
    %c3_19 = arith.constant 3 : index
    %17 = memref.load %arg3[%c0_18, %c3_19] : memref<3x4xf32, #tpu.memory_space<smem>>
    %18 = vector.broadcast %17 : f32 to vector<2x128xf32>
    %19 = arith.mulf %7, %18 : vector<2x128xf32>
    %20 = arith.addf %10, %13 : vector<2x128xf32>
    %21 = arith.addf %16, %19 : vector<2x128xf32>
    %22 = arith.addf %20, %21 : vector<2x128xf32>
    %c0_20 = arith.constant 0 : index
    %23 = memref.load %arg4[%c0_20] : memref<3xf32, #tpu.memory_space<smem>>
    %24 = vector.broadcast %23 : f32 to vector<2x128xf32>
    %25 = arith.addf %22, %24 : vector<2x128xf32>
    %c0_21 = arith.constant 0 : index
    %c0_22 = arith.constant 0 : index
    %c0_23 = arith.constant 0 : index
    %c0_24 = arith.constant 0 : index
    %26 = vector.load %arg5[%c0_21, %c0_22, %c0_23, %c0_24] : memref<1x3x2x128xf32, #tpu.memory_space<vmem>>, vector<1x1x2x128xf32>
    %27 = vector.shape_cast %26 : vector<1x1x2x128xf32> to vector<2x128xf32>
    %28 = vector.shape_cast %25 : vector<2x128xf32> to vector<1x1x2x128xf32>
    tpu.vector_store %arg5[%c0_21, %c0_22, %c0_23, %c0_24], %28 {strides = array<i32>} : memref<1x3x2x128xf32, #tpu.memory_space<vmem>>, vector<1x1x2x128xf32>,
    %c1_25 = arith.constant 1 : index
    %c0_26 = arith.constant 0 : index
    %29 = memref.load %arg3[%c1_25, %c0_26] : memref<3x4xf32, #tpu.memory_space<smem>>
    %30 = vector.broadcast %29 : f32 to vector<2x128xf32>
    %31 = arith.mulf %1, %30 : vector<2x128xf32>
    %c1_27 = arith.constant 1 : index
    %c1_28 = arith.constant 1 : index
    %32 = memref.load %arg3[%c1_27, %c1_28] : memref<3x4xf32, #tpu.memory_space<smem>>
    %33 = vector.broadcast %32 : f32 to vector<2x128xf32>
    %34 = arith.mulf %3, %33 : vector<2x128xf32>
    %c1_29 = arith.constant 1 : index
    %c2_30 = arith.constant 2 : index
    %35 = memref.load %arg3[%c1_29, %c2_30] : memref<3x4xf32, #tpu.memory_space<smem>>
    %36 = vector.broadcast %35 : f32 to vector<2x128xf32>
    %37 = arith.mulf %5, %36 : vector<2x128xf32>
    %c1_31 = arith.constant 1 : index
    %c3_32 = arith.constant 3 : index
    %38 = memref.load %arg3[%c1_31, %c3_32] : memref<3x4xf32, #tpu.memory_space<smem>>
    %39 = vector.broadcast %38 : f32 to vector<2x128xf32>
    %40 = arith.mulf %7, %39 : vector<2x128xf32>
    %41 = arith.addf %31, %34 : vector<2x128xf32>
    %42 = arith.addf %37, %40 : vector<2x128xf32>
    %43 = arith.addf %41, %42 : vector<2x128xf32>
    %c1_33 = arith.constant 1 : index
    %44 = memref.load %arg4[%c1_33] : memref<3xf32, #tpu.memory_space<smem>>
    %45 = vector.broadcast %44 : f32 to vector<2x128xf32>
    %46 = arith.addf %43, %45 : vector<2x128xf32>
    %c0_34 = arith.constant 0 : index
    %c1_35 = arith.constant 1 : index
    %c0_36 = arith.constant 0 : index
    %c0_37 = arith.constant 0 : index
    %47 = vector.load %arg5[%c0_34, %c1_35, %c0_36, %c0_37] : memref<1x3x2x128xf32, #tpu.memory_space<vmem>>, vector<1x1x2x128xf32>
    %48 = vector.shape_cast %47 : vector<1x1x2x128xf32> to vector<2x128xf32>
    %49 = vector.shape_cast %46 : vector<2x128xf32> to vector<1x1x2x128xf32>
    tpu.vector_store %arg5[%c0_34, %c1_35, %c0_36, %c0_37], %49 {strides = array<i32>} : memref<1x3x2x128xf32, #tpu.memory_space<vmem>>, vector<1x1x2x128xf32>,
    %c2_38 = arith.constant 2 : index
    %c0_39 = arith.constant 0 : index
    %50 = memref.load %arg3[%c2_38, %c0_39] : memref<3x4xf32, #tpu.memory_space<smem>>
    %51 = vector.broadcast %50 : f32 to vector<2x128xf32>
    %52 = arith.mulf %1, %51 : vector<2x128xf32>
    %c2_40 = arith.constant 2 : index
    %c1_41 = arith.constant 1 : index
    %53 = memref.load %arg3[%c2_40, %c1_41] : memref<3x4xf32, #tpu.memory_space<smem>>
    %54 = vector.broadcast %53 : f32 to vector<2x128xf32>
    %55 = arith.mulf %3, %54 : vector<2x128xf32>
    %c2_42 = arith.constant 2 : index
    %c2_43 = arith.constant 2 : index
    %56 = memref.load %arg3[%c2_42, %c2_43] : memref<3x4xf32, #tpu.memory_space<smem>>
    %57 = vector.broadcast %56 : f32 to vector<2x128xf32>
    %58 = arith.mulf %5, %57 : vector<2x128xf32>
    %c2_44 = arith.constant 2 : index
    %c3_45 = arith.constant 3 : index
    %59 = memref.load %arg3[%c2_44, %c3_45] : memref<3x4xf32, #tpu.memory_space<smem>>
    %60 = vector.broadcast %59 : f32 to vector<2x128xf32>
    %61 = arith.mulf %7, %60 : vector<2x128xf32>
    %62 = arith.addf %52, %55 : vector<2x128xf32>
    %63 = arith.addf %58, %61 : vector<2x128xf32>
    %64 = arith.addf %62, %63 : vector<2x128xf32>
    %c2_46 = arith.constant 2 : index
    %65 = memref.load %arg4[%c2_46] : memref<3xf32, #tpu.memory_space<smem>>
    %66 = vector.broadcast %65 : f32 to vector<2x128xf32>
    %67 = arith.addf %64, %66 : vector<2x128xf32>
    %c0_47 = arith.constant 0 : index
    %c2_48 = arith.constant 2 : index
    %c0_49 = arith.constant 0 : index
    %c0_50 = arith.constant 0 : index
    %68 = vector.load %arg5[%c0_47, %c2_48, %c0_49, %c0_50] : memref<1x3x2x128xf32, #tpu.memory_space<vmem>>, vector<1x1x2x128xf32>
    %69 = vector.shape_cast %68 : vector<1x1x2x128xf32> to vector<2x128xf32>
    %70 = vector.shape_cast %67 : vector<2x128xf32> to vector<1x1x2x128xf32>
    tpu.vector_store %arg5[%c0_47, %c2_48, %c0_49, %c0_50], %70 {strides = array<i32>} : memref<1x3x2x128xf32, #tpu.memory_space<vmem>>, vector<1x1x2x128xf32>,
    return
  }
  func.func @transform_0(%arg0: i32, %arg1: i32) -> (i32, i32, i32, i32) {
    %c0_i32 = arith.constant 0 : i32
    %c0_i32_0 = arith.constant 0 : i32
    %c0_i32_1 = arith.constant 0 : i32
    return %arg0, %c0_i32, %arg1, %c0_i32_0 : i32, i32, i32, i32
  }
  func.func @transform_1(%arg0: i32, %arg1: i32) -> (i32, i32) {
    %c0_i32 = arith.constant 0 : i32
    %c0_i32_0 = arith.constant 0 : i32
    %c0_i32_1 = arith.constant 0 : i32
    return %c0_i32, %c0_i32_0 : i32, i32
  }
  func.func @transform_2(%arg0: i32, %arg1: i32) -> i32 {
    %c0_i32 = arith.constant 0 : i32
    %c0_i32_0 = arith.constant 0 : i32
    return %c0_i32 : i32
  }
  func.func @transform_3(%arg0: i32, %arg1: i32) -> (i32, i32, i32, i32) {
    %c0_i32 = arith.constant 0 : i32
    %c0_i32_0 = arith.constant 0 : i32
    %c0_i32_1 = arith.constant 0 : i32
    return %arg0, %c0_i32, %arg1, %c0_i32_0 : i32, i32, i32, i32
  }
}

</mosaic_0001>

<bundles_post_ra>
// kernel: outconv_forward.1
= control target key start
LH: loop header
LB: loop body
LE: loop exit
PB: predicated region body
PF: predicated region fallthrough
CT: control target
= control target key end

     0   :  { %8 = vsyncpa [#allocation3], 0  ;;  %s650_s0 = inlined_call_operand.vmem [shape: f32[2,4,2,128], index: 0, kind: input, shape index: {}]   ;;  %s651_s1 = inlined_call_operand.vmem [shape: f32[3,4], index: 1, kind: input, shape index: {}]   ;;  %s652_s2 = inlined_call_operand.vmem [shape: f32[3], index: 2, kind: input, shape index: {}]   ;;  %s653_s3 = inlined_call_operand.vmem [shape: f32[2,3,2,128], index: 3, kind: output, shape index: {}]  }
   0x1   :  { %9 = vsyncpa [#allocation5], 0  ;;  %s564_s12 = smov 0   ;;  %s566_s13 = smov 0  }
   0x2   :  { %s568_s14 = smov 0  }
   0x3 LB: > { %s401_s15 = sadd.s32 4294967295, %s540_s14   ;;  %s27_s16 = sadd.s32 1, %s536_s13  ;;  %s540_s14 = sphi %s568_s14, %s15_s14   ;;  %s536_s13 = sphi %s566_s13, %s663_s13   ;;  %s532_s12 = sphi %s564_s12, %s662_s12  }
   0x4   : > { %p29_p0 = scmp.ge.s32.totalorder %s27_s16, 2  ;;  %p403_p1 = scmp.ge.s32.totalorder %s540_s14, 1 }
   0x5   : > { %p130_p2 = scmp.lt.s32.totalorder %s540_s14, 3  ;;  %p589_p4 = scmp.eq.s32.totalorder %s401_s15, 0 }
   0x6   : > { %s665_s16 = smov (%p29_p0, %s27_s16), 0  ;;  %s143_s21 = sshll.u32 %s651_s1, 4  ;;  %s144_s21 = int_to_ptr.vmem [resolvable:$true] %s143_s21 }
   0x7   : > { %p585_p3 = pnand %p403_p1, %p130_p2  ;;  %s154_s24 = sshll.u32 %s652_s2, 4  ;;  %s155_s24 = int_to_ptr.vmem [resolvable:$true] %s154_s24 }
   0x8   : > { %s658_s18 = scalar_select %p589_p4, 1, 0 }
   0x9   : > { %s657_s17 = scalar_select %p585_p3, 1, 0 }
   0xa   : > { %p443_p5 = pneg %p585_p3  ;;  %s480_s26 = scalar_lea.vmem %s144_s21, 64 }
   0xb   : > { %p481_p7 = scmp.ne.s32.totalorder %s144_s21, %s480_s26  ;;  %p488_p11 = scmp.lt.s32.totalorder %s144_s21, %s144_s21 }
   0xc   : > { %p603_p6 = pnand %p589_p4, %p443_p5  ;;  %p489_p12 = scmp.lt.s32.totalorder %s480_s26, %s480_s26 }
   0xe   : > { %p482_p8 = pneg %p603_p6  ;;  %p490_p13 = por %p489_p12, %p488_p11 }
  0x10   : > { %p483_p9 = pnand %p482_p8, %p481_p7 }
  0x12   : > { %p484_p10 = pneg %p483_p9 }
  0x14   : > { %p491_p0 = pnand %p490_p13, %p484_p10 }
  0x16   : > { %494 = shalt.err (!%p491_p0)
}
  0x17   : > { %s542_s27 = smov [#allocation2]   ;;  %s495_s28 = scalar_lea.vmem %s155_s24, 16 }
  0x18   : > { %446 = dma.vmem_to_smem (!%p603_p6), %s144_s21, 64, %s542_s27, [#allocation3]  }
  0x19   : > { %p496_p1 = scmp.ne.s32.totalorder %s155_s24, %s495_s28  ;;  %p503_p4 = scmp.lt.s32.totalorder %s155_s24, %s155_s24 }
  0x1a   : > { %p504_p3 = scmp.lt.s32.totalorder %s495_s28, %s495_s28 }
  0x1b   : > { %p498_p2 = pnand %p496_p1, %p482_p8 }
  0x1c   : > { %p505_p7 = por %p504_p3, %p503_p4 }
  0x1d   : > { %p499_p5 = pneg %p498_p2 }
  0x1f   : > { %p506_p9 = pnand %p505_p7, %p499_p5 }
  0x21   : > { %509 = shalt.err (!%p506_p9)
}
  0x22   : > { %s543_s29 = smov [#allocation4]   ;;  %p660_p10 = scmp.ne.s32.totalorder %s657_s17, 0 }
  0x23   : > { %449 = dma.vmem_to_smem (!%p603_p6), %s155_s24, 16, %s543_s29, [#allocation5]  }
  0x24   : > { %178 = sbr.rel (%p660_p10) target bundleno = 74 (0x4a), region = 32  ;;  %p661_p11 = scmp.ne.s32.totalorder (!%p660_p10), %s658_s18, 0 }
  0x2b   : > { %523 = dma.done.wait (%p661_p11), [#allocation3], 64  }
  0x2c   : > { %525 = vsyncadd (%p661_p11), [#allocation3], 4294967232 }
  0x2d   : > { %527 = dma.done.wait (%p661_p11), [#allocation5], 16  }
  0x2e   : > { %529 = vsyncadd (%p661_p11), [#allocation5], 4294967280 }
  0x2f   : > { %188 = sfence }
  0x30   : > { %p213_p3 = scmp.lt.s32.totalorder %s532_s12, 1  ;;  %s236_s30 = sld [smem:[#allocation2]] }
  0x31   : > { %s416_s4 = sld [smem:[#allocation2 + $0x1]]  ;;  %s417_s5 = sld [smem:[#allocation2 + $0x2]] }
  0x32   : > { %s667_s12 = smov (!%p213_p3, %s532_s12), 1  ;;  %s418_s6 = sld [smem:[#allocation2 + $0x3]] }
  0x33   : > { %s433_s7 = sshll.u32 %s667_s12, 3  ;;  %s628_s8 = sld [smem:[#allocation4]] }
  0x34   : > { %s220_s11 = scalar_lea.vmem %s650_s0, %s433_s7  ;;  %s419_s15 = sld [smem:[#allocation2 + $0x80]] }
  0x35   : > { %v229_v0 = vld [vmem:[%s220_s11] sm:$0x3]  ;;  %v413_v1 = vld [vmem:[%s220_s11 + $0x2] sm:$0x3]  ;;  %v414_v2 = vld [vmem:[%s220_s11 + $0x4] sm:$0x3] }
  0x36   : > { %v237_v3 = vstv %s236_s30  ;;  %v415_v4 = vld [vmem:[%s220_s11 + $0x6] sm:$0x3]  ;;  %s420_s17 = sld [smem:[#allocation2 + $0x81]]  ;;  %s421_s18 = sld [smem:[#allocation2 + $0x82]] }
  0x37   : > { %v238_v5 = vmul.f32 %v237_v3, %v229_v0  ;;  %v240_v6 = vstv %s416_s4  ;;  %v243_v7 = vstv %s417_s5  ;;  %s422_s19 = sld [smem:[#allocation2 + $0x83]]  ;;  %s633_s20 = sld [smem:[#allocation4 + $0x1]] }
  0x38   : > { %v241_v8 = vmul.f32 %v413_v1, %v240_v6  ;;  %v244_v9 = vmul.f32 %v414_v2, %v243_v7  ;;  %v246_v10 = vstv %s418_s6  ;;  %s425_s21 = sld [smem:[#allocation2 + $0x100]]  ;;  %s426_s22 = sld [smem:[#allocation2 + $0x101]] }
  0x39   : > { %v247_v11 = vmul.f32 %v415_v4, %v246_v10  ;;  %s427_s23 = sld [smem:[#allocation2 + $0x102]]  ;;  %s428_s24 = sld [smem:[#allocation2 + $0x103]]  ;;  %v252_v16 = vstv %s628_s8 }
  0x3a   : > { %v248_v12 = vadd.f32 %v241_v8, %v238_v5  ;;  %s434_s25 = smul.u32 6, %s667_s12  ;;  %v256_v13 = vstv %s419_s15  ;;  %s429_s26 = sld [smem:[#allocation4 + $0x2]] }
  0x3b   : > { %v249_v14 = vadd.f32 %v247_v11, %v244_v9  ;;  %v257_v15 = vmul.f32 %v256_v13, %v229_v0 }
  0x3c   : > { %v259_v17 = vstv %s420_s17  ;;  %v262_v18 = vstv %s421_s18  ;;  %s228_s29 = scalar_lea.vmem %s653_s3, %s434_s25 }
  0x3d   : > { %v250_v19 = vadd.f32 %v249_v14, %v248_v12  ;;  %v260_v20 = vmul.f32 %v413_v1, %v259_v17  ;;  %v263_v21 = vmul.f32 %v414_v2, %v262_v18  ;;  %v265_v22 = vstv %s422_s19 }
  0x3e   : > { %v266_v23 = vmul.f32 %v415_v4, %v265_v22  ;;  %v276_v24 = vstv %s425_s21  ;;  %v279_v25 = vstv %s426_s22  ;;  %v271_v33 = vstv %s633_s20 }
  0x3f   : > { %v253_v26 = vadd.f32 %v252_v16, %v250_v19  ;;  %v267_v27 = vadd.f32 %v260_v20, %v257_v15  ;;  %v277_v28 = vmul.f32 %v276_v24, %v229_v0  ;;  %v280_v29 = vmul.f32 %v413_v1, %v279_v25 }
  0x40   : > { %v268_v30 = vadd.f32 %v266_v23, %v263_v21  ;;  %v282_v31 = vstv %s427_s23  ;;  %v285_v32 = vstv %s428_s24  ;;  %v291_v40 = vstv %s429_s26 }
  0x41   : > { %254 = vst [vmem:[%s228_s29] sm:$0x3] %v253_v26  ;;  %v283_v34 = vmul.f32 %v414_v2, %v282_v31  ;;  %v286_v35 = vmul.f32 %v415_v4, %v285_v32  ;;  %v287_v36 = vadd.f32 %v280_v29, %v277_v28 }
  0x42   : > { %v269_v37 = vadd.f32 %v268_v30, %v267_v27 }
  0x43   : > { %v288_v38 = vadd.f32 %v286_v35, %v283_v34 }
  0x44   : > { %v272_v39 = vadd.f32 %v271_v33, %v269_v37 }
  0x45   : > { %v289_v41 = vadd.f32 %v288_v38, %v287_v36 }
  0x46   : > { %424 = vst [vmem:[%s228_s29 + $0x2] sm:$0x3] %v272_v39 }
  0x47   : > { %v292_v42 = vadd.f32 %v291_v40, %v289_v41 }
  0x49   : > { %430 = vst [vmem:[%s228_s29 + $0x4] sm:$0x3] %v292_v42 }
  0x4a PF: > { %s15_s14 = sadd.s32 1, %s540_s14   ;;  %s662_s12 = smov %s536_s13 }
  0x4b   : > { %p12_p4 = scmp.ge.s32.totalorder %s15_s14, 4   ;;  %s663_s13 = smov %s665_s16 }
  0x4d   :  { %14 = sbr.rel (!%p12_p4) target bundleno = 3 (0x3), region = 76 }
  0x54   :  { %322 = vsyncpa [#allocation3], 1 }
  0x55   :  { %324 = vsyncpa [#allocation3 + $0x1], 1 }
  0x56   :  { %325 = vsyncpa [#allocation5], 1 }

</bundles_post_ra>
